<compile_context>
chip_gen: v7x
topology: tpu7x:2x2x1
jax: 0.10.0
libtpu: 0.0.40
codegen_flags: <defaults>
</compile_context>

<pallas_src>
import functools
import math

import jax
import jax.numpy as jnp
from jax import lax
from jax.experimental import pallas as pl
from jax.experimental.pallas import tpu as pltpu


def _pick_tile(n: int, cap: int) -> int:
    """Largest multiple-of-8 divisor of n that is <= cap (fallback: n itself)."""
    best = None
    t = 8
    upper = min(n, cap)
    while t <= upper:
        if n % t == 0:
            best = t
        t += 8
    return best if best is not None else n


# ---------------------------------------------------------------------------
# Kernel 1: QKV projection  qkv = (x @ W_qkv^T + b) with Q columns pre-scaled.
# ---------------------------------------------------------------------------
def _qkv_proj_kernel(x_ref, w_ref, b_ref, qkv_ref, *, embed_size, scale):
    x = x_ref[...].astype(jnp.bfloat16)                      # (tm, E)
    acc = lax.dot_general(                                   # (tm, 3E), f32 acc
        x, w_ref[...],
        dimension_numbers=(((1,), (1,)), ((), ())),          # contract E with E (RHS transposed)
        preferred_element_type=jnp.float32)
    qkv = acc + b_ref[...]                                   # bias add in f32
    col = lax.broadcasted_iota(jnp.int32, (1, 3 * embed_size), 1)
    qscale = jnp.where(col < embed_size, jnp.float32(scale), jnp.float32(1.0))
    qkv_ref[...] = (qkv * qscale).astype(qkv_ref.dtype)      # bf16 store


# ---------------------------------------------------------------------------
# Kernel 2: flash-style causal attention + output projection.
# ---------------------------------------------------------------------------
def _flash_attn_kernel(qkv_q_ref, qkv_k_ref, w_out_ref, b_out_ref, o_ref,
                       m_sc, l_sc, acc_sc, *, n_head, head_size, q_tile, k_tile):
    qi = pl.program_id(1)
    ki = pl.program_id(2)
    E = n_head * head_size
    hs = head_size

    @pl.when(ki == 0)
    def _init():
        m_sc[...] = jnp.full_like(m_sc, -1e30)
        l_sc[...] = jnp.zeros_like(l_sc)
        acc_sc[...] = jnp.zeros_like(acc_sc)

    first_q = qi * q_tile
    last_q = first_q + (q_tile - 1)
    first_k = ki * k_tile
    last_k = first_k + (k_tile - 1)

    def process(apply_mask):
        def _body():
            qkv_q = qkv_q_ref[...]          # (q_tile, 3E) bf16 (Q cols pre-scaled)
            qkv_k = qkv_k_ref[...]          # (k_tile, 3E) bf16
            if apply_mask:                  # built once per kv step (diagonal blocks only)
                row = first_q + lax.broadcasted_iota(jnp.int32, (q_tile, k_tile), 0)
                col = first_k + lax.broadcasted_iota(jnp.int32, (q_tile, k_tile), 1)
                causal = col <= row
            for h in range(n_head):         # static lane slices, no transposes
                q_h = qkv_q[:, h * hs:(h + 1) * hs]                    # (q_tile, hs)
                k_h = qkv_k[:, E + h * hs:E + (h + 1) * hs]            # (k_tile, hs)
                v_h = qkv_k[:, 2 * E + h * hs:2 * E + (h + 1) * hs]    # (k_tile, hs)
                s = lax.dot_general(                                   # (q_tile, k_tile) f32
                    q_h, k_h,
                    dimension_numbers=(((1,), (1,)), ((), ())),
                    preferred_element_type=jnp.float32)
                if apply_mask:
                    s = jnp.where(causal, s, jnp.float32(-1e30))
                m_prev = m_sc[h]                                       # (q_tile, 1)
                m_new = jnp.maximum(m_prev, jnp.max(s, axis=-1, keepdims=True))
                alpha = jnp.exp(m_prev - m_new)
                p = jnp.exp(s - m_new)                                 # f32 (VPU/EUP in f32)
                l_sc[h] = alpha * l_sc[h] + jnp.sum(p, axis=-1, keepdims=True)
                pv = jnp.dot(p.astype(jnp.bfloat16), v_h,
                             preferred_element_type=jnp.float32)       # (q_tile, hs)
                acc_sc[:, h * hs:(h + 1) * hs] = (
                    alpha * acc_sc[:, h * hs:(h + 1) * hs] + pv)
                m_sc[h] = m_new
        return _body

    # kv block fully visible (all keys <= all queries): no masking work.
    pl.when(last_k <= first_q)(process(apply_mask=False))
    # kv block straddling the diagonal: apply causal mask.
    pl.when(jnp.logical_and(first_k <= last_q, last_k > first_q))(
        process(apply_mask=True))
    # kv blocks entirely above the diagonal (first_k > last_q): skipped.

    @pl.when(ki == pl.num_programs(2) - 1)
    def _finalize():
        for h in range(n_head):
            inv_l = pl.reciprocal(l_sc[h], approx=True)                # EUP, ~free
            acc_sc[:, h * hs:(h + 1) * hs] = acc_sc[:, h * hs:(h + 1) * hs] * inv_l
        att = acc_sc[...].astype(jnp.bfloat16)                         # (q_tile, E)
        y = lax.dot_general(                                           # out projection
            att, w_out_ref[...],
            dimension_numbers=(((1,), (1,)), ((), ())),
            preferred_element_type=jnp.float32)
        y = y + b_out_ref[...]
        o_ref[...] = y.astype(o_ref.dtype)


def causal_self_attention(x, w_qkv, b_qkv, w_out, b_out, n_head):
    """x: (B, T, E). Weights in PyTorch nn.Linear layout:
    w_qkv: (3E, E), b_qkv: (3E,), w_out: (E, E), b_out: (E,)."""
    B, T, E = x.shape
    assert E % n_head == 0
    hs = E // n_head
    scale = 1.0 / math.sqrt(hs)
    rows = B * T

    # Keep (out, in) layout; only narrow to bf16 for the MXU (halves weight DMA).
    w_qkv_bf = w_qkv.astype(jnp.bfloat16)
    w_out_bf = w_out.astype(jnp.bfloat16)
    b_qkv2 = b_qkv.reshape(1, 3 * E).astype(jnp.float32)
    b_out2 = b_out.reshape(1, E).astype(jnp.float32)

    x2 = x.reshape(rows, E)  # fold (B, T) -> rows

    tm = _pick_tile(rows, 256)   # projection row tile
    tq = _pick_tile(T, 128)      # query tile
    tk = _pick_tile(T, 128)      # key tile
    # TODO(synk): T not a multiple of 8 would need explicit key-padding masks.
    nq = T // tq
    nk = T // tk

    # --- Kernel 1: QKV projection --------------------------------------------
    qkv = pl.pallas_call(
        functools.partial(_qkv_proj_kernel, embed_size=E, scale=scale),
        out_shape=jax.ShapeDtypeStruct((rows, 3 * E), jnp.bfloat16),
        grid_spec=pltpu.PrefetchScalarGridSpec(
            num_scalar_prefetch=0,
            grid=(rows // tm,),
            in_specs=[
                pl.BlockSpec((tm, E), lambda i: (i, 0)),
                pl.BlockSpec((3 * E, E), lambda i: (0, 0)),
                pl.BlockSpec((1, 3 * E), lambda i: (0, 0)),
            ],
            out_specs=pl.BlockSpec((tm, 3 * E), lambda i: (i, 0)),
        ),
        compiler_params=pltpu.CompilerParams(
            dimension_semantics=("parallel",)),
    )(x2, w_qkv_bf, b_qkv2)

    # --- Kernel 2: flash attention + output projection ------------------------
    attn_kernel = functools.partial(
        _flash_attn_kernel, n_head=n_head, head_size=hs,
        q_tile=tq, k_tile=tk)

    y2 = pl.pallas_call(
        attn_kernel,
        out_shape=jax.ShapeDtypeStruct((rows, E), x.dtype),
        grid_spec=pltpu.PrefetchScalarGridSpec(
            num_scalar_prefetch=0,
            grid=(B, nq, nk),
            in_specs=[
                pl.BlockSpec((tq, 3 * E), lambda b, q, k: (b * nq + q, 0)),  # query slab
                pl.BlockSpec((tk, 3 * E), lambda b, q, k: (b * nk + k, 0)),  # key/value slab
                pl.BlockSpec((E, E), lambda b, q, k: (0, 0)),                # W_out (resident)
                pl.BlockSpec((1, E), lambda b, q, k: (0, 0)),                # b_out (resident)
            ],
            out_specs=pl.BlockSpec((tq, E), lambda b, q, k: (b * nq + q, 0)),
            scratch_shapes=[
                pltpu.VMEM((n_head, tq, 1), jnp.float32),   # running max m
                pltpu.VMEM((n_head, tq, 1), jnp.float32),   # running sum l
                pltpu.VMEM((tq, E), jnp.float32),           # accumulator (per-head cols)
            ],
        ),
        compiler_params=pltpu.CompilerParams(
            dimension_semantics=("parallel", "parallel", "arbitrary")),
    )(qkv, qkv, w_out_bf, b_out2)

    return y2.reshape(B, T, E)


def _reference(x, w_qkv, b_qkv, w_out, b_out, n_head):
    B, T, E = x.shape
    hs = E // n_head
    qkv = jnp.einsum('bte,oe->bto', x, w_qkv) + b_qkv
    q, k, v = jnp.split(qkv, 3, axis=2)

    def heads(t):
        return t.reshape(B, T, n_head, hs).transpose(0, 2, 1, 3)

    q, k, v = heads(q), heads(k), heads(v)
    scores = jnp.einsum('bhtd,bhsd->bhts', q, k) / math.sqrt(hs)
    mask = jnp.tril(jnp.ones((T, T), bool))
    scores = jnp.where(mask[None, None], scores, -jnp.inf)
    p = jax.nn.softmax(scores, axis=-1)
    out = jnp.einsum('bhts,bhsd->bhtd', p, v)
    out = out.transpose(0, 2, 1, 3).reshape(B, T, E)
    return jnp.einsum('bte,oe->bto', out, w_out) + b_out


if __name__ == "__main__":
    # Config: context_length=8, n_layer=2, n_head=4, embed_size=32
    B, T, E, n_head, n_layer = 2, 8, 32, 4, 2
    std = 0.02 * (2 * n_layer) ** (-0.5)

    key = jax.random.PRNGKey(0)
    kx, kw1, kw2 = jax.random.split(key, 3)

    x = jax.random.normal(kx, (B, T, E), dtype=jnp.float32)
    # attention_layer: Linear(E, 3E) -> weight (3E, E), bias (3E,) zero
    w_qkv = std * jax.random.normal(kw1, (3 * E, E), dtype=jnp.float32)
    b_qkv = jnp.zeros((3 * E,), jnp.float32)
    # out_proj: Linear(E, E) -> weight (E, E), bias (E,) zero
    w_out = std * jax.random.normal(kw2, (E, E), dtype=jnp.float32)
    b_out = jnp.zeros((E,), jnp.float32)

    y = causal_self_attention(x, w_qkv, b_qkv, w_out, b_out, n_head)
    y = jax.block_until_ready(y)

    y_ref = _reference(x, w_qkv, b_qkv, w_out, b_out, n_head)
    assert y.shape == (B, T, E)
    # bf16 MXU operands with f32 accumulation: looser tolerance vs the f32 reference.
    err = jnp.max(jnp.abs(y - y_ref))
    assert jnp.allclose(y, y_ref, atol=2e-3, rtol=5e-2), f"mismatch vs reference (max abs err {err})"

    print("KERNEL_OK")
</pallas_src>

<mosaic_0001>
module attributes {stable_mosaic.version = 11 : i64} {
  func.func @_qkv_proj_kernel(%arg0: i32, %arg1: memref<16x32xf32, #tpu.memory_space<vmem>>, %arg2: memref<96x32xbf16, #tpu.memory_space<vmem>>, %arg3: memref<1x96xf32, #tpu.memory_space<vmem>>, %arg4: memref<16x96xbf16, #tpu.memory_space<vmem>>) attributes {dimension_semantics = [#tpu.dimension_semantics<parallel>], iteration_bounds = array<i64: 1>, scalar_prefetch = 0 : i64, scratch_operands = 0 : i64, tpu.core_type = #tpu.core_type<tc>, window_params = [{transform_indices = @transform_0, window_bounds = array<i64: 16, 32>}, {pipeline_mode = #tpu.pipeline_mode<synchronous>, transform_indices = @transform_1, window_bounds = array<i64: 96, 32>}, {pipeline_mode = #tpu.pipeline_mode<synchronous>, transform_indices = @transform_2, window_bounds = array<i64: 1, 96>}, {transform_indices = @transform_3, window_bounds = array<i64: 16, 96>}]} {
    %c0 = arith.constant 0 : index
    %c0_0 = arith.constant 0 : index
    %0 = vector.load %arg1[%c0, %c0_0] : memref<16x32xf32, #tpu.memory_space<vmem>>, vector<16x32xf32>
    %1 = arith.truncf %0 : vector<16x32xf32> to vector<16x32xbf16>
    %c0_1 = arith.constant 0 : index
    %c0_2 = arith.constant 0 : index
    %2 = vector.load %arg2[%c0_1, %c0_2] : memref<96x32xbf16, #tpu.memory_space<vmem>>, vector<96x32xbf16>
    %cst = arith.constant dense<0.000000e+00> : vector<16x96xf32>
    %3 = tpu.matmul %1, %2, %cst {dimension_numbers = #tpu.dot_dimension_numbers<[1], [1], [0], [0], [0, 0, 1, 0], [], []>} : vector<16x32xbf16>, vector<96x32xbf16>, vector<16x96xf32> -> vector<16x96xf32>
    %c0_3 = arith.constant 0 : index
    %c0_4 = arith.constant 0 : index
    %4 = vector.load %arg3[%c0_3, %c0_4] : memref<1x96xf32, #tpu.memory_space<vmem>>, vector<1x96xf32>
    %5 = vector.broadcast %4 : vector<1x96xf32> to vector<16x96xf32>
    %6 = arith.addf %3, %5 : vector<16x96xf32>
    %7 = tpu.iota {dimensions = array<i32: 1>} : vector<1x96xi32>
    %c32_i32 = arith.constant 32 : i32
    %8 = vector.broadcast %c32_i32 : i32 to vector<1x96xi32>
    %9 = arith.cmpi slt, %7, %8 : vector<1x96xi32>
    %cst_5 = arith.constant 0.353553385 : f32
    %cst_6 = arith.constant 1.000000e+00 : f32
    %10 = vector.broadcast %cst_5 : f32 to vector<1x96xf32>
    %11 = vector.broadcast %cst_6 : f32 to vector<1x96xf32>
    %12 = arith.select %9, %10, %11 : vector<1x96xi1>, vector<1x96xf32>
    %13 = vector.broadcast %12 : vector<1x96xf32> to vector<16x96xf32>
    %14 = arith.mulf %6, %13 : vector<16x96xf32>
    %15 = arith.truncf %14 : vector<16x96xf32> to vector<16x96xbf16>
    %c0_7 = arith.constant 0 : index
    %c0_8 = arith.constant 0 : index
    %16 = vector.load %arg4[%c0_7, %c0_8] : memref<16x96xbf16, #tpu.memory_space<vmem>>, vector<16x96xbf16>
    tpu.vector_store %arg4[%c0_7, %c0_8], %15 {strides = array<i32>} : memref<16x96xbf16, #tpu.memory_space<vmem>>, vector<16x96xbf16>,
    return
  }
  func.func @transform_0(%arg0: i32) -> (i32, i32) {
    %c0_i32 = arith.constant 0 : i32
    %c0_i32_0 = arith.constant 0 : i32
    return %arg0, %c0_i32 : i32, i32
  }
  func.func @transform_1(%arg0: i32) -> (i32, i32) {
    %c0_i32 = arith.constant 0 : i32
    %c0_i32_0 = arith.constant 0 : i32
    %c0_i32_1 = arith.constant 0 : i32
    return %c0_i32, %c0_i32_0 : i32, i32
  }
  func.func @transform_2(%arg0: i32) -> (i32, i32) {
    %c0_i32 = arith.constant 0 : i32
    %c0_i32_0 = arith.constant 0 : i32
    %c0_i32_1 = arith.constant 0 : i32
    return %c0_i32, %c0_i32_0 : i32, i32
  }
  func.func @transform_3(%arg0: i32) -> (i32, i32) {
    %c0_i32 = arith.constant 0 : i32
    %c0_i32_0 = arith.constant 0 : i32
    return %arg0, %c0_i32 : i32, i32
  }
}

</mosaic_0001>

<bundles_post_ra>
// kernel: tpu_custom_call.1
= control target key start
LH: loop header
LB: loop body
LE: loop exit
PB: predicated region body
PF: predicated region fallthrough
CT: control target
= control target key end

     0   :  { %v235_v1 = vmov 0.0   ;;  %vm68_vm0 = vcmask 261120   ;;  %vm236_vm1 = vmmov 0   ;;  %s307_s0 = inlined_call_operand.vmem [shape: f32[16,32], index: 0, kind: input, shape index: {}]   ;;  %s308_s1 = inlined_call_operand.vmem [shape: bf16[96,32], index: 1, kind: input, shape index: {}]   ;;  %s309_s2 = inlined_call_operand.vmem [shape: f32[1,96], index: 2, kind: input, shape index: {}]   ;;  %s310_s3 = inlined_call_operand.hbm [shape: bf16[16,96], index: 3, kind: output, shape index: {}]  }
   0x1   :  { %v205_v0 = vld [vmem:[%s308_s1] sm:$0xff]   ;;  %183 = vmatprep.subr.bf16.mxu0 %v235_v1  ;;  %v206_v3 = vld [vmem:[%s308_s1 + $0x8] sm:$0xff]   ;;  %195 = vmatprep.mubr.msk.bf16.mxu0 %vm236_vm1, %v235_v1 }
   0x2   :  { %v73_v2 = vsel %vm68_vm0, %v205_v0, 0 }
   0x3   :  { %184 = vmatpush3.bf16.xpose.msra.mxu0 %v73_v2 }
   0x4   :  { %185 = vmatprep.subr.bf16.mxu0 %v235_v1 }
   0x5   :  { %8 = vsyncpa [#allocation3], 0  ;;  %v76_v4 = vsel %vm68_vm0, %v206_v3, 0  ;;  %v207_v5 = vld [vmem:[%s308_s1 + $0x10] sm:$0xff]   ;;  %v208_v7 = vld [vmem:[%s308_s1 + $0x18] sm:$0xff]   ;;  %v131_v16 = vlaneseq  ;;  %v237_v20 = vmov 1.0  }
   0x6   :  { %v79_v6 = vsel %vm68_vm0, %v207_v5, 0  ;;  %v82_v8 = vsel %vm68_vm0, %v208_v7, 0  ;;  %v209_v9 = vld [vmem:[%s308_s1 + $0x20] sm:$0xff]   ;;  %v210_v11 = vld [vmem:[%s308_s1 + $0x28] sm:$0xff]   ;;  %vm145_vm3 = vcmask 781312  }
   0x7   :  { %v85_v10 = vsel %vm68_vm0, %v209_v9, 0  ;;  %v88_v12 = vsel %vm68_vm0, %v210_v11, 0  ;;  %v16_v13 = vld [vmem:[%s307_s0] sm:$0xff]  ;;  %v17_v14 = vld [vmem:[%s307_s0 + $0x8] sm:$0xff]  ;;  %v132_v17 = vand.u32 127, %v131_v16  ;;  %s238_s0 = smov [#allocation2]  }
   0x8   :  { %v18_v15 = vpack.c.bf16 %v17_v14, %v16_v13  ;;  %v164_v18 = vld [vmem:[%s309_s2] ss:$0 sm:$0xff]  ;;  %s153_s1 = sshll.u32 %s238_s0, 4  ;;  %s154_s1 = int_to_ptr.vmem [resolvable:$true] %s153_s1 }
   0x9   :  { %vm133_vm2 = vcmp.lt.s32.totalorder %v132_v17, 32  ;;  %s211_s30 = scalar_lea.vmem %s154_s1, 128  ;;  %p216_p1 = scmp.lt.s32.totalorder %s154_s1, %s154_s1 }
   0xa   :  { %v134_v21 = vsel %vm133_vm2, 0.35355338, %v237_v20  ;;  %p212_p0 = scmp.ne.s32.totalorder %s154_s1, %s211_s30  ;;  %p217_p2 = scmp.lt.s32.totalorder %s211_s30, %s211_s30 }
   0xb   :  { %186 = vmatpush3.bf16.xpose.msra.mxu0 %v76_v4 }
   0xc   :  { %187 = vmatprep.subr.bf16.mxu0 %v235_v1  ;;  %p218_p3 = por %p217_p2, %p216_p1 }
   0xe   :  { %p219_p4 = pnand %p218_p3, %p212_p0 }
  0x13   :  { %188 = vmatpush3.bf16.xpose.msra.mxu0 %v79_v6 }
  0x14   :  { %189 = vmatprep.subr.bf16.mxu0 %v235_v1 }
  0x1b   :  { %190 = vmatpush3.bf16.xpose.msra.mxu0 %v82_v8 }
  0x1c   :  { %191 = vmatprep.subr.bf16.mxu0 %v235_v1 }
  0x23   :  { %192 = vmatpush3.bf16.xpose.msra.mxu0 %v85_v10 }
  0x24   :  { %193 = vmatprep.subr.bf16.mxu0 %v235_v1 }
  0x2b   :  { %194 = vmatpush3.bf16.xpose.msra.mxu0 %v88_v12 }
  0x32   :  { %196 = vmatmul.mubr.msk.bf16.vlgmr.msra.gmra.mrb[0].mxu0 %vm68_vm0, %v18_v15 }
 0x105   :  { %v124_v19 = vpop.f32.mrb[0].mxu0 }
 0x106   :  { %v125_v22 = vadd.f32 %v164_v18, %v124_v19  ;;  %v197_v23 = vpop.f32.mrb[1].mxu0 }
 0x107   :  { %v127_v24 = vpop.f32.mrb[2].mxu0 }
 0x108   :  { %v135_v25 = vmul.f32 %v134_v21, %v125_v22  ;;  %v128_v26 = vadd.f32 %v164_v18, %v127_v24  ;;  %v198_v27 = vpop.f32.mrb[3].mxu0 }
 0x10a   :  { %v174_v28 = vpack.c.bf16 %v135_v25, %v135_v25  ;;  %v136_v29 = vmul.f32 %v134_v21, %v128_v26 }
 0x10c   :  { %146 = vst.msk [vmem:[#allocation2] sm:$0xf] %vm145_vm3, %v174_v28  ;;  %v175_v30 = vpack.c.bf16 %v136_v29, %v136_v29 }
 0x10e   :  { %147 = vst.msk [vmem:[#allocation2 + $0x4] sm:$0xf] %vm145_vm3, %v175_v30 }
 0x10f   :  { %222 = shalt.err (!%p219_p4)
}
 0x110   :  { %s223_s5 = scalar_lea.hbm %s310_s3, 128 }
 0x111   :  { %p224_p5 = scmp.ne.s32.totalorder %s310_s3, %s223_s5  ;;  %p227_p6 = scmp.lt.u32.totalorder %s223_s5, %s310_s3 }
 0x113   :  { %p229_p7 = pnand %p227_p6, %p224_p5 }
 0x115   :  { %232 = shalt.err (!%p229_p7)
}
 0x116   :  { %s239_s10 = smov 64   ;;  %s240_s11 = smov 4  }
 0x117   :  { %159 = dma.vmem_to_hbm [thread:$0]  %s154_s1, 128, %s310_s3, [#allocation3], %s239_s10, %s239_s10, %s240_s11  }
 0x118   :  { %233 = dma.done.wait [#allocation3], 128  }
 0x119   :  { %234 = vsyncadd [#allocation3], 4294967168 }
 0x11a   :  { %163 = vsyncpa [#allocation3], 1 }

</bundles_post_ra>
